<compile_context>
chip_gen: v7x
topology: tpu7x:2x2x1
jax: 0.10.0
libtpu: 0.0.40
codegen_flags: <defaults>
</compile_context>

<pallas_src>
import functools

import jax
import jax.numpy as jnp
from jax import lax
from jax.experimental import pallas as pl
from jax.experimental.pallas import tpu as pltpu


def basic_block_kernel(x_ref, w1_ref, s1_ref, b1_ref, w2_ref, s2_ref, b2_ref,
                       out_ref, hid_ref, *, B, P, H):
    # x_ref:   (B*P, WC) f32, lane-packed & row-padded: image b occupies rows
    #          b*P+1 .. b*P+H with 1 zero row above and >= 7 zero rows below.
    # w*_ref:  (3*WC, WC) fused block-Toeplitz conv weights (3 dy taps stacked
    #          along K), compute dtype (bf16 by default).
    # s*/b*:   (1, WC) folded BatchNorm scale / bias (f32).
    # out_ref: (B, H, WC) output block.
    # hid_ref: (B*P + 8, WC) VMEM scratch; hid_ref[j + 8] holds the hidden
    #          activation of packed row j+1 (8-row zero prologue keeps all
    #          scratch stores 8-row aligned).
    R = B * P
    M = R - 8                          # matmul M-dim, a multiple of 8
    WC = x_ref.shape[1]
    f32 = jnp.float32
    cdt = w1_ref.dtype

    # Zero the pad row-groups of the hidden scratch that conv2 reads.  Done
    # unconditionally (two aligned 8-row stores, negligible) so the kernel is
    # correct if the batch grid axis is sharded across TensorCores (v7x).
    zeros8 = jnp.zeros((8, WC), hid_ref.dtype)
    hid_ref[0:8, :] = zeros8
    hid_ref[M + 8:M + 16, :] = zeros8

    # ---- conv1: one lane-dense MXU matmul with K = 3*WC (dy taps fused) ----
    # LHS built from three direct ref slices (no relayout of a materialized
    # value); cast to the MXU compute dtype, accumulate in f32.
    xcat = jnp.concatenate(
        [x_ref[0:M, :], x_ref[1:M + 1, :], x_ref[2:M + 2, :]], axis=1)
    acc = jnp.dot(xcat.astype(cdt), w1_ref[...], preferred_element_type=f32)

    # bn1 + relu (f32 VPU); zero rows whose conv centre is an image padding
    # row so they act as the zero padding of the hidden activation.
    hid = jnp.maximum(acc * s1_ref[...] + b1_ref[...], 0.0)
    r = lax.broadcasted_iota(jnp.int32, (M, 1), 0)
    hid = jnp.where((r % P) < H, hid, 0.0)
    hid_ref[8:M + 8, :] = hid.astype(hid_ref.dtype)    # aligned M-row store

    # ---- conv2: same fused-K matmul over the row-padded hidden activation ----
    hcat = jnp.concatenate(
        [hid_ref[7:M + 7, :], hid_ref[8:M + 8, :], hid_ref[9:M + 9, :]],
        axis=1)
    acc2 = jnp.dot(hcat, w2_ref[...], preferred_element_type=f32)

    # bn2 + residual add (exact f32 skip path straight from x_ref) + relu.
    out = acc2 * s2_ref[...] + b2_ref[...]
    out = jnp.maximum(out + x_ref[1:M + 1, :], 0.0)

    # Lane-dense, 8-aligned per-image stores of the H valid rows.
    for b in range(B):
        out_ref[b] = out[b * P:b * P + H, :].astype(out_ref.dtype)


def _block_toeplitz_fused(w_oihw, width):
    """(Cout, Cin, 3, 3) conv weights -> (3*width*Cin, width*Cout) matrix.

    Row block dy, entry [wi*Cin + ci, wo*Cout + co] = w[co, ci, dy, wi-wo+1]
    (zero when wi-wo+1 is outside [0, 2]), so a 3x3 / stride-1 / pad-1 conv on
    lane-packed rows is a single matmul per output row block:
        out_rows = concat_dy(rows[dy : dy+M]) @ W_fused
    The W-boundary zero padding is baked into the zeros of the matrix.
    """
    taps = []
    for dy in range(3):
        t = None
        for dx in range(3):
            band = jnp.eye(width, k=1 - dx, dtype=jnp.float32)
            blk = jnp.kron(band, w_oihw[:, :, dy, dx].T.astype(jnp.float32))
            t = blk if t is None else t + blk
        taps.append(t)
    return jnp.concatenate(taps, axis=0)          # (3*W*Cin, W*Cout)


def _pick_block_batch(n, p, target_rows=512):
    """Largest divisor B of n with B*p - 8 <= target_rows, preferring a grid
    of >= 2 steps so ("parallel",) can shard across both v7x TensorCores."""
    divisors = [b for b in range(1, n + 1) if n % b == 0]
    multi_step = [b for b in divisors if n // b >= 2] or divisors
    fits = [b for b in multi_step if b * p - 8 <= target_rows]
    return max(fits) if fits else min(multi_step)


def basic_block_forward(x_nchw, params, *, eps=1e-5, block_batch=None,
                        compute_dtype=jnp.bfloat16, out_dtype=jnp.float32):
    """Fused BasicBlock forward.  x_nchw: (N, C, H, W) float32 (NCHW)."""
    (w1, g1, be1, m1, v1, w2, g2, be2, m2, v2) = params

    N, C, H, W = x_nchw.shape
    Cout = w1.shape[0]
    # Residual add requires inplanes == planes, stride 1, no downsample.
    assert Cout == C and w1.shape == (C, C, 3, 3) and w2.shape == (C, C, 3, 3)
    WC = W * C
    # Lane-dense packing assumes the folded (w, c) axis fills full 128-lane
    # vregs.  TODO(synk): channel-major im2col fallback for other shapes.
    assert WC % 128 == 0, f"W*C = {WC} must be a multiple of 128"

    P = ((H + 7) // 8) * 8 + 8        # rows per image slot (>= H+8, mult of 8)
    if block_batch is None:
        block_batch = _pick_block_batch(N, P)
    B = block_batch
    assert N % B == 0

    # Fold BatchNorm (eval mode) into per-channel scale/bias, tiled to the
    # (w, c) lane layout (lane index = w*C + c).
    s1 = g1 / jnp.sqrt(v1 + eps)
    bb1 = be1 - m1 * s1
    s2 = g2 / jnp.sqrt(v2 + eps)
    bb2 = be2 - m2 * s2
    s1p = jnp.tile(s1, W).reshape(1, WC).astype(jnp.float32)
    b1p = jnp.tile(bb1, W).reshape(1, WC).astype(jnp.float32)
    s2p = jnp.tile(s2, W).reshape(1, WC).astype(jnp.float32)
    b2p = jnp.tile(bb2, W).reshape(1, WC).astype(jnp.float32)

    # NCHW -> NHWC -> lane-packed (N*P, W*C) with per-image zero row padding
    # (1 row above, P-H-1 >= 7 rows below).  x stays f32 so the residual path
    # is exact; the MXU LHS is cast to compute_dtype inside the kernel.
    x = jnp.transpose(x_nchw, (0, 2, 3, 1)).reshape(N, H, WC)
    x = jnp.pad(x, ((0, 0), (1, P - H - 1), (0, 0))).astype(jnp.float32)
    x = x.reshape(N * P, WC)

    w1f = _block_toeplitz_fused(w1, W).astype(compute_dtype)   # (3*WC, WC)
    w2f = _block_toeplitz_fused(w2, W).astype(compute_dtype)

    kernel = functools.partial(basic_block_kernel, B=B, P=P, H=H)

    out = pl.pallas_call(
        kernel,
        out_shape=jax.ShapeDtypeStruct((N, H, WC), out_dtype),
        grid_spec=pltpu.PrefetchScalarGridSpec(
            num_scalar_prefetch=0,
            grid=(N // B,),
            in_specs=[
                pl.BlockSpec((B * P, WC), lambda i: (i, 0)),       # x (packed)
                pl.BlockSpec((3 * WC, WC), lambda i: (0, 0)),      # conv1 fused taps
                pl.BlockSpec((1, WC), lambda i: (0, 0)),           # bn1 scale
                pl.BlockSpec((1, WC), lambda i: (0, 0)),           # bn1 bias
                pl.BlockSpec((3 * WC, WC), lambda i: (0, 0)),      # conv2 fused taps
                pl.BlockSpec((1, WC), lambda i: (0, 0)),           # bn2 scale
                pl.BlockSpec((1, WC), lambda i: (0, 0)),           # bn2 bias
            ],
            out_specs=pl.BlockSpec((B, H, WC), lambda i: (i, 0, 0)),
            scratch_shapes=[pltpu.VMEM((B * P + 8, WC), compute_dtype)],
        ),
        compiler_params=pltpu.CompilerParams(
            dimension_semantics=("parallel",)),
    )(x, w1f, s1p, b1p, w2f, s2p, b2p)

    # (N, H, W*C) -> (N, H, W, C) -> NCHW
    return jnp.transpose(out.reshape(N, H, W, C), (0, 3, 1, 2))


def basic_block_reference(x_nchw, params, eps=1e-5):
    """Pure-JAX reference (lax.conv) of the same forward pass, for checking."""
    (w1, g1, be1, m1, v1, w2, g2, be2, m2, v2) = params

    def conv3x3(x, w):
        return lax.conv_general_dilated(
            x, w, window_strides=(1, 1), padding=((1, 1), (1, 1)),
            dimension_numbers=("NCHW", "OIHW", "NCHW"))

    def bn(x, g, b, m, v):
        inv = g / jnp.sqrt(v + eps)
        return x * inv[None, :, None, None] + (b - m * inv)[None, :, None, None]

    out = jnp.maximum(bn(conv3x3(x_nchw, w1), g1, be1, m1, v1), 0.0)
    out = bn(conv3x3(out, w2), g2, be2, m2, v2)
    return jnp.maximum(out + x_nchw, 0.0)


if __name__ == "__main__":
    key = jax.random.PRNGKey(0)
    N, C, H, W = 8, 8, 16, 16          # W*C = 128 -> fully lane-dense packing
    ks = jax.random.split(key, 11)

    x = jax.random.normal(ks[0], (N, C, H, W), jnp.float32)

    w1 = 0.1 * jax.random.normal(ks[1], (C, C, 3, 3), jnp.float32)
    g1 = 1.0 + 0.1 * jax.random.normal(ks[2], (C,), jnp.float32)
    be1 = 0.1 * jax.random.normal(ks[3], (C,), jnp.float32)
    m1 = 0.1 * jax.random.normal(ks[4], (C,), jnp.float32)
    v1 = jax.random.uniform(ks[5], (C,), jnp.float32, 0.5, 1.5)

    w2 = 0.1 * jax.random.normal(ks[6], (C, C, 3, 3), jnp.float32)
    g2 = 1.0 + 0.1 * jax.random.normal(ks[7], (C,), jnp.float32)
    be2 = 0.1 * jax.random.normal(ks[8], (C,), jnp.float32)
    m2 = 0.1 * jax.random.normal(ks[9], (C,), jnp.float32)
    v2 = jax.random.uniform(ks[10], (C,), jnp.float32, 0.5, 1.5)

    params = (w1, g1, be1, m1, v1, w2, g2, be2, m2, v2)

    ref = jax.block_until_ready(basic_block_reference(x, params))

    # f32 MXU path, explicit block_batch (grid = 4): tight correctness check.
    out_f32 = jax.block_until_ready(
        basic_block_forward(x, params, block_batch=2,
                            compute_dtype=jnp.float32))
    assert out_f32.shape == (N, C, H, W)
    err_f32 = float(jnp.max(jnp.abs(out_f32 - ref)))
    assert err_f32 < 1e-3, f"f32 max abs err = {err_f32}"

    # Default path: bf16 MXU inputs, f32 accumulation / BN / residual,
    # auto block_batch (B = 4 images -> M = 88 rows per step, grid = 2).
    out = jax.block_until_ready(basic_block_forward(x, params))
    err = float(jnp.max(jnp.abs(out - ref)))
    assert err < 1e-1, f"bf16 max abs err = {err}"

    print("KERNEL_OK")
</pallas_src>

<mosaic_0001>
module attributes {stable_mosaic.version = 11 : i64} {
  func.func @basic_block_kernel(%arg0: i32, %arg1: memref<48x128xf32, #tpu.memory_space<vmem>>, %arg2: memref<384x128xf32, #tpu.memory_space<vmem>>, %arg3: memref<1x128xf32, #tpu.memory_space<vmem>>, %arg4: memref<1x128xf32, #tpu.memory_space<vmem>>, %arg5: memref<384x128xf32, #tpu.memory_space<vmem>>, %arg6: memref<1x128xf32, #tpu.memory_space<vmem>>, %arg7: memref<1x128xf32, #tpu.memory_space<vmem>>, %arg8: memref<2x16x128xf32, #tpu.memory_space<vmem>>, %arg9: memref<56x128xf32, #tpu.memory_space<vmem>>) attributes {dimension_semantics = [#tpu.dimension_semantics<parallel>], iteration_bounds = array<i64: 4>, scalar_prefetch = 0 : i64, scratch_operands = 1 : i64, tpu.core_type = #tpu.core_type<tc>, window_params = [{transform_indices = @transform_0, window_bounds = array<i64: 48, 128>}, {pipeline_mode = #tpu.pipeline_mode<synchronous>, transform_indices = @transform_1, window_bounds = array<i64: 384, 128>}, {pipeline_mode = #tpu.pipeline_mode<synchronous>, transform_indices = @transform_2, window_bounds = array<i64: 1, 128>}, {pipeline_mode = #tpu.pipeline_mode<synchronous>, transform_indices = @transform_3, window_bounds = array<i64: 1, 128>}, {pipeline_mode = #tpu.pipeline_mode<synchronous>, transform_indices = @transform_4, window_bounds = array<i64: 384, 128>}, {pipeline_mode = #tpu.pipeline_mode<synchronous>, transform_indices = @transform_5, window_bounds = array<i64: 1, 128>}, {pipeline_mode = #tpu.pipeline_mode<synchronous>, transform_indices = @transform_6, window_bounds = array<i64: 1, 128>}, {transform_indices = @transform_7, window_bounds = array<i64: 2, 16, 128>}]} {
    %cst = arith.constant 0.000000e+00 : f32
    %0 = vector.broadcast %cst : f32 to vector<8x128xf32>
    %c0 = arith.constant 0 : index
    %c0_0 = arith.constant 0 : index
    %1 = vector.load %arg9[%c0, %c0_0] : memref<56x128xf32, #tpu.memory_space<vmem>>, vector<8x128xf32>
    tpu.vector_store %arg9[%c0, %c0_0], %0 {strides = array<i32>} : memref<56x128xf32, #tpu.memory_space<vmem>>, vector<8x128xf32>,
    %c48 = arith.constant 48 : index
    %c0_1 = arith.constant 0 : index
    %2 = vector.load %arg9[%c48, %c0_1] : memref<56x128xf32, #tpu.memory_space<vmem>>, vector<8x128xf32>
    tpu.vector_store %arg9[%c48, %c0_1], %0 {strides = array<i32>} : memref<56x128xf32, #tpu.memory_space<vmem>>, vector<8x128xf32>,
    %c0_2 = arith.constant 0 : index
    %c0_3 = arith.constant 0 : index
    %3 = vector.load %arg1[%c0_2, %c0_3] : memref<48x128xf32, #tpu.memory_space<vmem>>, vector<40x128xf32>
    %c1 = arith.constant 1 : index
    %c0_4 = arith.constant 0 : index
    %4 = vector.load %arg1[%c1, %c0_4] : memref<48x128xf32, #tpu.memory_space<vmem>>, vector<40x128xf32>
    %c2 = arith.constant 2 : index
    %c0_5 = arith.constant 0 : index
    %5 = vector.load %arg1[%c2, %c0_5] : memref<48x128xf32, #tpu.memory_space<vmem>>, vector<40x128xf32>
    %6 = tpu.concatenate %3, %4, %5 in 1 : vector<40x128xf32>, vector<40x128xf32>, vector<40x128xf32> -> vector<40x384xf32>
    %c0_6 = arith.constant 0 : index
    %c0_7 = arith.constant 0 : index
    %7 = vector.load %arg2[%c0_6, %c0_7] : memref<384x128xf32, #tpu.memory_space<vmem>>, vector<384x128xf32>
    %cst_8 = arith.constant dense<0.000000e+00> : vector<40x128xf32>
    %8 = tpu.matmul %6, %7, %cst_8 {dimension_numbers = #tpu.dot_dimension_numbers<[1], [0], [0], [1], [0, 0, 1, 1], [], []>} : vector<40x384xf32>, vector<384x128xf32>, vector<40x128xf32> -> vector<40x128xf32>
    %c0_9 = arith.constant 0 : index
    %c0_10 = arith.constant 0 : index
    %9 = vector.load %arg3[%c0_9, %c0_10] : memref<1x128xf32, #tpu.memory_space<vmem>>, vector<1x128xf32>
    %10 = vector.broadcast %9 : vector<1x128xf32> to vector<40x128xf32>
    %11 = arith.mulf %8, %10 : vector<40x128xf32>
    %c0_11 = arith.constant 0 : index
    %c0_12 = arith.constant 0 : index
    %12 = vector.load %arg4[%c0_11, %c0_12] : memref<1x128xf32, #tpu.memory_space<vmem>>, vector<1x128xf32>
    %13 = vector.broadcast %12 : vector<1x128xf32> to vector<40x128xf32>
    %14 = arith.addf %11, %13 : vector<40x128xf32>
    %cst_13 = arith.constant 0.000000e+00 : f32
    %15 = vector.broadcast %cst_13 : f32 to vector<40x128xf32>
    %16 = arith.maximumf %14, %15 : vector<40x128xf32>
    %17 = tpu.iota {dimensions = array<i32: 0>} : vector<40x1xi32>
    %c24_i32 = arith.constant 24 : i32
    %c0_i32 = arith.constant 0 : i32
    %18 = arith.cmpi eq, %c24_i32, %c0_i32 : i32
    %c1_i32 = arith.constant 1 : i32
    %19 = arith.select %18, %c1_i32, %c24_i32 : i32
    %20 = vector.broadcast %19 : i32 to vector<40x1xi32>
    %21 = arith.remsi %17, %20 : vector<40x1xi32>
    %c0_i32_14 = arith.constant 0 : i32
    %22 = vector.broadcast %c0_i32_14 : i32 to vector<40x1xi32>
    %23 = arith.cmpi ne, %21, %22 : vector<40x1xi32>
    %c0_i32_15 = arith.constant 0 : i32
    %24 = vector.broadcast %c0_i32_15 : i32 to vector<40x1xi32>
    %25 = arith.cmpi slt, %21, %24 : vector<40x1xi32>
    %c0_i32_16 = arith.constant 0 : i32
    %26 = arith.cmpi slt, %19, %c0_i32_16 : i32
    %27 = vector.broadcast %26 : i1 to vector<40x1xi1>
    %28 = vector.broadcast %27 : vector<40x1xi1> to vector<40x1xi1>
    %29 = arith.xori %25, %28 : vector<40x1xi1>
    %30 = arith.andi %29, %23 : vector<40x1xi1>
    %31 = vector.broadcast %19 : i32 to vector<40x1xi32>
    %32 = arith.addi %21, %31 : vector<40x1xi32>
    %33 = arith.select %30, %32, %21 : vector<40x1xi1>, vector<40x1xi32>
    %c16_i32 = arith.constant 16 : i32
    %34 = vector.broadcast %c16_i32 : i32 to vector<40x1xi32>
    %35 = arith.cmpi slt, %33, %34 : vector<40x1xi32>
    %cst_17 = arith.constant 0.000000e+00 : f32
    %36 = vector.shape_cast %35 : vector<40x1xi1> to vector<40x1xi1>
    %37 = vector.broadcast %36 : vector<40x1xi1> to vector<40x128xi1>
    %38 = vector.broadcast %cst_17 : f32 to vector<40x128xf32>
    %39 = arith.select %37, %16, %38 : vector<40x128xi1>, vector<40x128xf32>
    %c8 = arith.constant 8 : index
    %c0_18 = arith.constant 0 : index
    %40 = vector.load %arg9[%c8, %c0_18] : memref<56x128xf32, #tpu.memory_space<vmem>>, vector<40x128xf32>
    tpu.vector_store %arg9[%c8, %c0_18], %39 {strides = array<i32>} : memref<56x128xf32, #tpu.memory_space<vmem>>, vector<40x128xf32>,
    %c7 = arith.constant 7 : index
    %c0_19 = arith.constant 0 : index
    %41 = vector.load %arg9[%c7, %c0_19] : memref<56x128xf32, #tpu.memory_space<vmem>>, vector<40x128xf32>
    %c8_20 = arith.constant 8 : index
    %c0_21 = arith.constant 0 : index
    %42 = vector.load %arg9[%c8_20, %c0_21] : memref<56x128xf32, #tpu.memory_space<vmem>>, vector<40x128xf32>
    %c9 = arith.constant 9 : index
    %c0_22 = arith.constant 0 : index
    %43 = vector.load %arg9[%c9, %c0_22] : memref<56x128xf32, #tpu.memory_space<vmem>>, vector<40x128xf32>
    %44 = tpu.concatenate %41, %42, %43 in 1 : vector<40x128xf32>, vector<40x128xf32>, vector<40x128xf32> -> vector<40x384xf32>
    %c0_23 = arith.constant 0 : index
    %c0_24 = arith.constant 0 : index
    %45 = vector.load %arg5[%c0_23, %c0_24] : memref<384x128xf32, #tpu.memory_space<vmem>>, vector<384x128xf32>
    %cst_25 = arith.constant dense<0.000000e+00> : vector<40x128xf32>
    %46 = tpu.matmul %44, %45, %cst_25 {dimension_numbers = #tpu.dot_dimension_numbers<[1], [0], [0], [1], [0, 0, 1, 1], [], []>} : vector<40x384xf32>, vector<384x128xf32>, vector<40x128xf32> -> vector<40x128xf32>
    %c0_26 = arith.constant 0 : index
    %c0_27 = arith.constant 0 : index
    %47 = vector.load %arg6[%c0_26, %c0_27] : memref<1x128xf32, #tpu.memory_space<vmem>>, vector<1x128xf32>
    %48 = vector.broadcast %47 : vector<1x128xf32> to vector<40x128xf32>
    %49 = arith.mulf %46, %48 : vector<40x128xf32>
    %c0_28 = arith.constant 0 : index
    %c0_29 = arith.constant 0 : index
    %50 = vector.load %arg7[%c0_28, %c0_29] : memref<1x128xf32, #tpu.memory_space<vmem>>, vector<1x128xf32>
    %51 = vector.broadcast %50 : vector<1x128xf32> to vector<40x128xf32>
    %52 = arith.addf %49, %51 : vector<40x128xf32>
    %c1_30 = arith.constant 1 : index
    %c0_31 = arith.constant 0 : index
    %53 = vector.load %arg1[%c1_30, %c0_31] : memref<48x128xf32, #tpu.memory_space<vmem>>, vector<40x128xf32>
    %54 = arith.addf %52, %53 : vector<40x128xf32>
    %cst_32 = arith.constant 0.000000e+00 : f32
    %55 = vector.broadcast %cst_32 : f32 to vector<40x128xf32>
    %56 = arith.maximumf %54, %55 : vector<40x128xf32>
    %57 = vector.extract_strided_slice %56 {offsets = [0, 0], sizes = [16, 128], strides = [1, 1]} : vector<40x128xf32> to vector<16x128xf32>
    %c0_33 = arith.constant 0 : index
    %c0_34 = arith.constant 0 : index
    %c0_35 = arith.constant 0 : index
    %58 = vector.load %arg8[%c0_33, %c0_34, %c0_35] : memref<2x16x128xf32, #tpu.memory_space<vmem>>, vector<1x16x128xf32>
    %59 = vector.shape_cast %58 : vector<1x16x128xf32> to vector<16x128xf32>
    %60 = vector.shape_cast %57 : vector<16x128xf32> to vector<1x16x128xf32>
    tpu.vector_store %arg8[%c0_33, %c0_34, %c0_35], %60 {strides = array<i32>} : memref<2x16x128xf32, #tpu.memory_space<vmem>>, vector<1x16x128xf32>,
    %61 = vector.extract_strided_slice %56 {offsets = [24, 0], sizes = [16, 128], strides = [1, 1]} : vector<40x128xf32> to vector<16x128xf32>
    %c1_36 = arith.constant 1 : index
    %c0_37 = arith.constant 0 : index
    %c0_38 = arith.constant 0 : index
    %62 = vector.load %arg8[%c1_36, %c0_37, %c0_38] : memref<2x16x128xf32, #tpu.memory_space<vmem>>, vector<1x16x128xf32>
    %63 = vector.shape_cast %62 : vector<1x16x128xf32> to vector<16x128xf32>
    %64 = vector.shape_cast %61 : vector<16x128xf32> to vector<1x16x128xf32>
    tpu.vector_store %arg8[%c1_36, %c0_37, %c0_38], %64 {strides = array<i32>} : memref<2x16x128xf32, #tpu.memory_space<vmem>>, vector<1x16x128xf32>,
    return
  }
  func.func @transform_0(%arg0: i32) -> (i32, i32) {
    %c0_i32 = arith.constant 0 : i32
    %c0_i32_0 = arith.constant 0 : i32
    return %arg0, %c0_i32 : i32, i32
  }
  func.func @transform_1(%arg0: i32) -> (i32, i32) {
    %c0_i32 = arith.constant 0 : i32
    %c0_i32_0 = arith.constant 0 : i32
    %c0_i32_1 = arith.constant 0 : i32
    return %c0_i32, %c0_i32_0 : i32, i32
  }
  func.func @transform_2(%arg0: i32) -> (i32, i32) {
    %c0_i32 = arith.constant 0 : i32
    %c0_i32_0 = arith.constant 0 : i32
    %c0_i32_1 = arith.constant 0 : i32
    return %c0_i32, %c0_i32_0 : i32, i32
  }
  func.func @transform_3(%arg0: i32) -> (i32, i32) {
    %c0_i32 = arith.constant 0 : i32
    %c0_i32_0 = arith.constant 0 : i32
    %c0_i32_1 = arith.constant 0 : i32
    return %c0_i32, %c0_i32_0 : i32, i32
  }
  func.func @transform_4(%arg0: i32) -> (i32, i32) {
    %c0_i32 = arith.constant 0 : i32
    %c0_i32_0 = arith.constant 0 : i32
    %c0_i32_1 = arith.constant 0 : i32
    return %c0_i32, %c0_i32_0 : i32, i32
  }
  func.func @transform_5(%arg0: i32) -> (i32, i32) {
    %c0_i32 = arith.constant 0 : i32
    %c0_i32_0 = arith.constant 0 : i32
    %c0_i32_1 = arith.constant 0 : i32
    return %c0_i32, %c0_i32_0 : i32, i32
  }
  func.func @transform_6(%arg0: i32) -> (i32, i32) {
    %c0_i32 = arith.constant 0 : i32
    %c0_i32_0 = arith.constant 0 : i32
    %c0_i32_1 = arith.constant 0 : i32
    return %c0_i32, %c0_i32_0 : i32, i32
  }
  func.func @transform_7(%arg0: i32) -> (i32, i32, i32) {
    %c0_i32 = arith.constant 0 : i32
    %c0_i32_0 = arith.constant 0 : i32
    %c0_i32_1 = arith.constant 0 : i32
    return %arg0, %c0_i32, %c0_i32_0 : i32, i32, i32
  }
}

</mosaic_0001>

<bundles_post_ra>
// kernel: tpu_custom_call.1
= control target key start
LH: loop header
LB: loop body
LE: loop exit
PB: predicated region body
PF: predicated region fallthrough
CT: control target
= control target key end

     0   :  { %s2193_s0 = inlined_call_operand.hbm [shape: f32[192,128], index: 0, kind: input, shape index: {}]   ;;  %s2194_s1 = inlined_call_operand.hbm [shape: f32[384,128], index: 1, kind: input, shape index: {}]   ;;  %s2195_s2 = inlined_call_operand.vmem [shape: f32[1,128], index: 2, kind: input, shape index: {}]   ;;  %s2196_s3 = inlined_call_operand.vmem [shape: f32[1,128], index: 3, kind: input, shape index: {}]   ;;  %s2197_s4 = inlined_call_operand.hbm [shape: f32[384,128], index: 4, kind: input, shape index: {}]   ;;  %s2198_s5 = inlined_call_operand.vmem [shape: f32[1,128], index: 5, kind: input, shape index: {}]   ;;  %s2199_s6 = inlined_call_operand.vmem [shape: f32[1,128], index: 6, kind: input, shape index: {}]   ;;  %s2200_s7 = inlined_call_operand.hbm [shape: f32[8,16,128], index: 7, kind: output, shape index: {}]  }
   0x1   :  { %2206 = sst [smem:[#allocation13_spill]] %s2194_s1 }
   0x2   :  { %12 = vsyncpa [#allocation4], 0 }
   0x3   :  { %14 = vsyncpa [#allocation4 + $0x1], 0 }
   0x4   :  { %15 = vsyncpa [#allocation7], 0 }
   0x5   :  { %16 = vsyncpa [#allocation5], 0 }
   0x6   :  { %18 = vsyncpa [#allocation5 + $0x1], 0  ;;  %s1767_s24 = smov 0   ;;  %s1769_s25 = smov 0  }
   0x7   :  { %s1771_s26 = smov 0   ;;  %s1773_s27 = smov 0  }
   0x8 LB: > { %s1788_s28 = sadd.s32 4294967295, %s1714_s27   ;;  %s1100_s29 = sadd.s32 4294967294, %s1714_s27   ;;  %s1714_s27 = sphi %s1773_s27, %s2245_s27   ;;  %s1710_s26 = sphi %s1771_s26, %s2244_s26   ;;  %s1706_s25 = sphi %s1769_s25, %s2243_s25   ;;  %s1702_s24 = sphi %s1767_s24, %s2242_s24  }
   0x9   : > { %p44_p0 = scmp.ne.s32.totalorder %s1706_s25, %s1702_s24  ;;  %p2201_p1 = scmp.eq.s32.totalorder %s1788_s28, 0 }
   0xa   : > { %p200_p3 = scmp.eq.s32.totalorder %s1100_s29, 3  ;;  %p1101_p5 = scmp.ge.s32.totalorder %s1714_s27, 1 }
   0xb   : > { %p1797_p4 = por %p2201_p1, %p44_p0  ;;  %p207_p7 = scmp.lt.s32.totalorder %s1714_s27, 5 }
   0xc   : > { %p1802_p6 = por %p200_p3, %p44_p0  ;;  %s1716_s10 = smov [#allocation6]  }
   0xd   : > { %s2207_s30 = scalar_select %p1797_p4, 1, 0 }
   0xe   : > { %s2208_s8 = scalar_select %p1802_p6, 1, 0 }
   0xf   : > { %p1807_p8 = pnand %p1101_p5, %p207_p7  ;;  %s219_s11 = sshll.u32 %s1716_s10, 4  ;;  %s220_s11 = int_to_ptr.vmem [resolvable:$true] %s219_s11 }
  0x10   : > { %s1717_s13 = smov [#allocation8]   ;;  %s2211_s1 = sld [smem:[#allocation13_spill]] }
  0x11   : > { %s2209_s9 = scalar_select %p1807_p8, 1, 0 }
  0x12   : > { %p1491_p9 = pneg %p1807_p8  ;;  %s238_s14 = sshll.u32 %s1717_s13, 4  ;;  %s1819_s14 = int_to_ptr.vmem [resolvable:$true] %s238_s14 }
  0x14   : > { %p1815_p10 = pnand %p1491_p9, %p2201_p1 }
  0x16   : > { %s1558_s17 = scalar_lea.hbm %s2211_s1, 6144  ;;  %p1560_p12 = pneg %p1815_p10 }
  0x17   : > { %p1559_p11 = scmp.ne.s32.totalorder %s2211_s1, %s1558_s17  ;;  %p1565_p3 = scmp.lt.u32.totalorder %s1558_s17, %s2211_s1 }
  0x19   : > { %p1561_p13 = pnand %p1560_p12, %p1559_p11 }
  0x1b   : > { %p1562_p0 = pneg %p1561_p13 }
  0x1d   : > { %p1567_p5 = pnand %p1565_p3, %p1562_p0 }
  0x1f   : > { %1570 = shalt.err (!%p1567_p5)
}
  0x20   : > { %s1571_s22 = scalar_lea.vmem %s220_s11, 6144  ;;  %p1579_p2 = scmp.lt.s32.totalorder %s220_s11, %s220_s11 }
  0x21   : > { %p1572_p7 = scmp.ne.s32.totalorder %s220_s11, %s1571_s22  ;;  %p1580_p6 = scmp.lt.s32.totalorder %s1571_s22, %s1571_s22 }
  0x23   : > { %p1574_p9 = pnand %p1572_p7, %p1560_p12  ;;  %p1581_p4 = por %p1580_p6, %p1579_p2 }
  0x25   : > { %p1575_p1 = pneg %p1574_p9 }
  0x27   : > { %p1582_p8 = pnand %p1581_p4, %p1575_p1 }
  0x29   : > { %1585 = shalt.err (!%p1582_p8)
}
  0x2a   : > { %s2204_s23 = smov 128   ;;  %s2205_s29 = smov 8  }
  0x2b   : > { %1494 = dma.hbm_to_vmem [thread:$0]  (!%p1815_p10), %s2211_s1, 6144, %s220_s11, [#allocation7], %s2204_s23, %s2204_s23, %s2205_s29  }
  0x2c   : > { %s1586_s17 = scalar_lea.hbm %s2197_s4, 6144 }
  0x2d   : > { %p1587_p1 = scmp.ne.s32.totalorder %s2197_s4, %s1586_s17  ;;  %p1593_p6 = scmp.lt.u32.totalorder %s1586_s17, %s2197_s4 }
  0x2f   : > { %p1589_p2 = pnand %p1587_p1, %p1560_p12 }
  0x31   : > { %p1590_p4 = pneg %p1589_p2 }
  0x33   : > { %p1595_p8 = pnand %p1593_p6, %p1590_p4 }
  0x35   : > { %1598 = shalt.err (!%p1595_p8)
}
  0x36   : > { %s1599_s11 = scalar_lea.vmem %s1819_s14, 6144  ;;  %p1607_p3 = scmp.lt.s32.totalorder %s1819_s14, %s1819_s14 }
  0x37   : > { %p1600_p11 = scmp.ne.s32.totalorder %s1819_s14, %s1599_s11  ;;  %p1608_p5 = scmp.lt.s32.totalorder %s1599_s11, %s1599_s11 }
  0x39   : > { %p1602_p13 = pnand %p1600_p11, %p1560_p12  ;;  %p1609_p7 = por %p1608_p5, %p1607_p3 }
  0x3b   : > { %p1603_p0 = pneg %p1602_p13 }
  0x3d   : > { %p1610_p9 = pnand %p1609_p7, %p1603_p0 }
  0x3f   : > { %1613 = shalt.err (!%p1610_p9)
}
  0x40   : > { %1497 = dma.hbm_to_vmem [thread:$0]  (!%p1815_p10), %s2197_s4, 6144, %s1819_s14, [#allocation7], %s2204_s23, %s2204_s23, %s2205_s29  }
  0x41   : > { %s1875_s12 = sadd.s32 1, %s1714_s27   ;;  %s31_s13 = sadd.s32 1, %s1710_s26 }
  0x42   : > { %s28_s15 = ssub.s32 %s1714_s27, %s1875_s12  ;;  %p38_p12 = scmp.ne.s32.totalorder %s1710_s26, %s1706_s25 }
  0x43   : > { %p29_p1 = scmp.eq.s32.totalorder %s28_s15, 0  ;;  %p39_p2 = scmp.eq.s32.totalorder %s1714_s27, 0 }
  0x44   : > { %p2212_p4 = scmp.eq.s32.totalorder %s1788_s28, 3  ;;  %p1508_p8 = scmp.lt.s32.totalorder %s1714_s27, 4 }
  0x45   : > { %s1891_s17 = scalar_select %p29_p1, %s1710_s26, %s31_s13  }
  0x46   : > { %p1885_p6 = por %p2212_p4, %p38_p12  ;;  %p40_p11 = por %p39_p2, %p38_p12 }
  0x47   : > { %s258_s18 = sand.u32 1, %s1710_s26   ;;  %s1122_s14 = smul.u32 768, %s1714_s27 }
  0x48   : > { %s1467_s19 = smul.u32 48, %s258_s18  ;;  %p1895_p10 = pnand %p1508_p8, %p40_p11 }
  0x49   : > { %s1902_s22 = scalar_lea.hbm %s2193_s0, %s1122_s14  ;;  %s1906_s15 = scalar_lea.sflag [#allocation4], %s258_s18 }
  0x4a   : > { %s262_s10 = scalar_lea.vmem [#allocation3], %s1467_s19  ;;  %s1614_s23 = scalar_lea.hbm %s1902_s22, 768 }
  0x4b   : > { %s269_s13 = sshll.u32 %s262_s10, 4  ;;  %p1615_p13 = scmp.ne.s32.totalorder %s1902_s22, %s1614_s23  ;;  %s1904_s13 = int_to_ptr.vmem [resolvable:$true] %s269_s13 }
  0x4c   : > { %p1616_p0 = pneg %p1895_p10  ;;  %s1619_s11 = scalar_lea.hbm %s2193_s0, 3072 }
  0x4d   : > { %p1620_p7 = scmp.lt.u32.totalorder %s1902_s22, %s2193_s0  ;;  %p1621_p9 = scmp.lt.u32.totalorder %s1619_s11, %s1614_s23 }
  0x4e   : > { %p1617_p3 = pnand %p1616_p0, %p1615_p13  ;;  %p1623_p1 = scmp.lt.u32.totalorder %s1614_s23, %s1902_s22 }
  0x4f   : > { %p1622_p12 = por %p1621_p9, %p1620_p7 }
  0x50   : > { %p1618_p5 = pneg %p1617_p3 }
  0x51   : > { %p1624_p2 = por %p1623_p1, %p1622_p12 }
  0x53   : > { %p1625_p4 = pnand %p1624_p2, %p1618_p5 }
  0x55   : > { %1628 = shalt.err (!%p1625_p4)
}
  0x56   : > { %s1629_s18 = scalar_lea.vmem %s1904_s13, 768  ;;  %s1720_s19 = smov [#allocation3]  }
  0x57   : > { %p1630_p8 = scmp.ne.s32.totalorder %s1904_s13, %s1629_s18  ;;  %s1634_s10 = sshll.u32 %s1720_s19, 4  ;;  %s1635_s10 = int_to_ptr.vmem [resolvable:$false] %s1634_s10 }
  0x58   : > { %s1636_s1 = scalar_lea.vmem %s1635_s10, 1536  ;;  %p1637_p3 = scmp.lt.s32.totalorder %s1904_s13, %s1635_s10 }
  0x59   : > { %p1632_p11 = pnand %p1630_p8, %p1616_p0  ;;  %p1638_p7 = scmp.lt.s32.totalorder %s1636_s1, %s1629_s18 }
  0x5b   : > { %p1633_p13 = pneg %p1632_p11  ;;  %p1639_p9 = por %p1638_p7, %p1637_p3 }
  0x5d   : > { %p1640_p12 = pnand %p1639_p9, %p1633_p13 }
  0x5f   : > { %1643 = shalt.err (!%p1640_p12)
}
  0x60   : > { %s2215_s23 = smov 8   ;;  %s2216_s29 = smov 128  }
  0x61   : > { %1501 = dma.hbm_to_vmem [thread:$0]  (!%p1895_p10), %s1902_s22, 768, %s1904_s13, %s1906_s15, %s2216_s29, %s2216_s29, %s2215_s23  }
  0x62   : > { %p2217_p0 = scmp.ne.s32.totalorder %s2209_s9, 0 }
  0x63   : > { %s1940_s14 = sand.u32 (!%p2217_p0), 1, %s1706_s25   ;;  %p2218_p5 = scmp.ne.s32.totalorder (!%p2217_p0), %s2207_s30, 0 }
  0x64   : > { %281 = sbr.rel (%p2217_p0) target bundleno = 635 (0x27b), region = 48  ;;  %s284_s11 = scalar_lea.sflag (!%p2217_p0), [#allocation4], %s1940_s14 }
  0x65   : > { %s1468_s21 = smul.u32 (!%p2217_p0), 48, %s1940_s14 }
  0x67   : > { %s1944_s18 = scalar_lea.vmem (!%p2217_p0), [#allocation3], %s1468_s21 }
  0x6b   : > { %1689 = dma.done.wait (%p2218_p5), %s284_s11, 768  }
  0x6c   : > { %1691 = vsyncadd (%p2218_p5), %s284_s11, 4294966528  ;;  %p2219_p10 = scmp.eq.s32.totalorder %s1788_s28, 0 }
  0x6e   : > { %1693 = dma.done.wait (%p2219_p10), [#allocation7], 12288   ;;  %p2220_p1 = pmov %p2219_p10 }
  0x6f   : > { %v1721_v0 = vmov 0.0|0.0   ;;  %vm1722_vm0 = vmmov 0   ;;  %v1723_v1 = vmov 0.0   ;;  %v361_v2 = vld [vmem:[#allocation6 + $0x80] sm:$0xff]  ;;  %v362_v3 = vld [vmem:[#allocation6 + $0x88] sm:$0xff]  ;;  %v363_v11 = vld [vmem:[#allocation6 + $0x90] sm:$0xff] }
  0x70   : > { %1695 = vsyncadd (%p2220_p1), [#allocation7], 4294955008  ;;  %1387 = vmatprep.subr.bf16.mxu1 %v1721_v0  ;;  %1293 = vmatprep.mubr.msk.f32.mxu1 %vm1722_vm0, %v1723_v1  ;;  %328 = vst [vmem:[#allocation2] sm:$0xff] %v1723_v1  ;;  %v345_v4 = vld [vmem:[#allocation6] sm:$0xff]  ;;  %v1355_v5 = vpack.c.bf16 %v362_v3, %v361_v2  ;;  %v346_v6 = vld [vmem:[#allocation6 + $0x8] sm:$0xff]  ;;  %s1109_s1 = sshll.u32 %s1940_s14, 5 }
  0x71   : > { %329 = vst [vmem:[#allocation2 + $0x30] sm:$0xff] %v1723_v1  ;;  %v377_v7 = vld [vmem:[#allocation6 + $0x100] sm:$0xff]  ;;  %v378_v8 = vld [vmem:[#allocation6 + $0x108] sm:$0xff]  ;;  %v1357_v9 = vpack.c.bf16 %v346_v6, %v345_v4  ;;  %v364_v12 = vld [vmem:[#allocation6 + $0x98] sm:$0xff]  ;;  %s325_s23 = scalar_lea.vmem [#allocation9], %s1109_s1  ;;  %s1124_s21 = sshll.u32 %s1788_s28, 9 }
  0x72   : > { %v1388_v10 = vpack.c.bf16 %v378_v8, %v377_v7  ;;  %v347_v13 = vld [vmem:[#allocation6 + $0x10] sm:$0xff]  ;;  %1356 = vmatprep.subr.bf16.mxu0 %v1355_v5  ;;  %v1359_v14 = vpack.c.bf16 %v364_v12, %v363_v11  ;;  %v348_v15 = vld [vmem:[#allocation6 + $0x18] sm:$0xff]  ;;  %v365_v20 = vld [vmem:[#allocation6 + $0xa0] sm:$0xff]  ;;  %s1008_s29 = sshll.u32 %s325_s23, 4  ;;  %s2150_s30 = scalar_lea.hbm %s2200_s7, %s1124_s21  ;;  %s2144_s29 = int_to_ptr.vmem [resolvable:$true] %s1008_s29 }
  0x73   : > { %v379_v16 = vld [vmem:[#allocation6 + $0x110] sm:$0xff]  ;;  %v380_v17 = vld [vmem:[#allocation6 + $0x118] sm:$0xff]  ;;  %1358 = vmatpush3.bf16.msra.mxu0 %v1357_v9  ;;  %v1361_v18 = vpack.c.bf16 %v348_v15, %v347_v13  ;;  %v366_v21 = vld [vmem:[#allocation6 + $0xa8] sm:$0xff]  ;;  %s994_s9 = scalar_lea.sflag [#allocation5], %s1940_s14  ;;  %s1644_s20 = scalar_lea.vmem %s2144_s29, 512 }
  0x74   : > { %1389 = vmatpush3.bf16.msra.mxu1 %v1388_v10  ;;  %v1391_v19 = vpack.c.bf16 %v380_v17, %v379_v16  ;;  %v349_v22 = vld [vmem:[#allocation6 + $0x20] sm:$0xff]  ;;  %1360 = vmatprep.subr.bf16.mxu0 %v1359_v14  ;;  %v1363_v23 = vpack.c.bf16 %v366_v21, %v365_v20  ;;  %v350_v24 = vld [vmem:[#allocation6 + $0x28] sm:$0xff]  ;;  %v367_v27 = vld [vmem:[#allocation6 + $0xb0] sm:$0xff]  ;;  %p1645_p2 = scmp.ne.s32.totalorder %s2144_s29, %s1644_s20  ;;  %s1724_s28 = smov [#allocation9]  }
  0x75   : > { %1390 = vmatprep.subr.bf16.mxu1 %v1721_v0  ;;  %v381_v25 = vld [vmem:[#allocation6 + $0x120] sm:$0xff]  ;;  %v382_v26 = vld [vmem:[#allocation6 + $0x128] sm:$0xff]  ;;  %v368_v28 = vld [vmem:[#allocation6 + $0xb8] sm:$0xff]  ;;  %v1365_v29 = vpack.c.bf16 %v350_v24, %v349_v22  ;;  %s1648_s22 = sshll.u32 %s1724_s28, 4  ;;  %s1649_s22 = int_to_ptr.vmem [resolvable:$false] %s1648_s22 }
  0x76   : > { %v1394_v30 = vpack.c.bf16 %v382_v26, %v381_v25  ;;  %v351_v31 = vld [vmem:[#allocation6 + $0x30] sm:$0xff]  ;;  %v1367_v32 = vpack.c.bf16 %v368_v28, %v367_v27  ;;  %v352_v33 = vld [vmem:[#allocation6 + $0x38] sm:$0xff]  ;;  %v369_v36 = vld [vmem:[#allocation6 + $0xc0] sm:$0xff]  ;;  %p1646_p4 = pnand %p1645_p2, %p1885_p6  ;;  %s1650_s13 = scalar_lea.vmem %s1649_s22, 1024 }
  0x77   : > { %1362 = vmatpush3.bf16.msra.mxu0 %v1361_v18  ;;  %v383_v34 = vld [vmem:[#allocation6 + $0x130] sm:$0xff]  ;;  %v384_v35 = vld [vmem:[#allocation6 + $0x138] sm:$0xff]  ;;  %v370_v37 = vld [vmem:[#allocation6 + $0xc8] sm:$0xff]  ;;  %v1369_v38 = vpack.c.bf16 %v352_v33, %v351_v31  ;;  %p1651_p11 = scmp.lt.s32.totalorder %s2144_s29, %s1649_s22  ;;  %p1652_p13 = scmp.lt.s32.totalorder %s1650_s13, %s1644_s20 }
  0x78   : > { %1392 = vmatpush3.bf16.msra.mxu1 %v1391_v19  ;;  %1364 = vmatprep.subr.bf16.mxu0 %v1363_v23  ;;  %v1397_v39 = vpack.c.bf16 %v384_v35, %v383_v34  ;;  %v353_v40 = vld [vmem:[#allocation6 + $0x40] sm:$0xff]  ;;  %v1371_v41 = vpack.c.bf16 %v370_v37, %v369_v36  ;;  %v354_v42 = vld [vmem:[#allocation6 + $0x48] sm:$0xff]  ;;  %v371_v45 = vld [vmem:[#allocation6 + $0xd0] sm:$0xff]  ;;  %p1647_p8 = pneg %p1646_p4 }
  0x79   : > { %1393 = vmatprep.subr.bf16.mxu1 %v1721_v0  ;;  %v385_v43 = vld [vmem:[#allocation6 + $0x140] sm:$0xff]  ;;  %v386_v44 = vld [vmem:[#allocation6 + $0x148] sm:$0xff]  ;;  %v372_v46 = vld [vmem:[#allocation6 + $0xd8] sm:$0xff]  ;;  %v1373_v48 = vpack.c.bf16 %v354_v42, %v353_v40  ;;  %p1653_p3 = por %p1652_p13, %p1651_p11 }
  0x7a   : > { %v1963_v47 = vld [vmem:[%s1944_s18 + $0x1] sm:$0xff]  ;;  %v1400_v49 = vpack.c.bf16 %v386_v44, %v385_v43  ;;  %v1375_v51 = vpack.c.bf16 %v372_v46, %v371_v45  ;;  %v1973_v24 = vld [vmem:[%s1944_s18 + $0x9] sm:$0xff]  ;;  %v337_v36 = vld [vmem:[%s1944_s18 + $0x11] sm:$0xff] }
  0x7b   : > { %1366 = vmatpush3.bf16.msra.mxu0 %v1365_v29  ;;  %v355_v50 = vld [vmem:[#allocation6 + $0x50] sm:$0xff]  ;;  %v356_v52 = vld [vmem:[#allocation6 + $0x58] sm:$0xff]  ;;  %v373_v55 = vld [vmem:[#allocation6 + $0xe0] sm:$0xff]  ;;  %457 = vmatprep.mubr.f32.mxu0 %v1963_v47  ;;  %p1654_p7 = pnand %p1653_p3, %p1647_p8 }
  0x7c   : > { %1395 = vmatpush3.bf16.msra.mxu1 %v1394_v30  ;;  %1368 = vmatprep.subr.bf16.mxu0 %v1367_v32  ;;  %v387_v53 = vld [vmem:[#allocation6 + $0x150] sm:$0xff]  ;;  %v388_v54 = vld [vmem:[#allocation6 + $0x158] sm:$0xff]  ;;  %v374_v56 = vld [vmem:[#allocation6 + $0xe8] sm:$0xff]  ;;  %v1377_v57 = vpack.c.bf16 %v356_v52, %v355_v50 }
  0x7d   : > { %1396 = vmatprep.subr.bf16.mxu1 %v1721_v0  ;;  %v1403_v58 = vpack.c.bf16 %v388_v54, %v387_v53  ;;  %v357_v59 = vld [vmem:[#allocation6 + $0x60] sm:$0xff]  ;;  %v1379_v60 = vpack.c.bf16 %v374_v56, %v373_v55  ;;  %v358_v61 = vld [vmem:[#allocation6 + $0x68] sm:$0xff]  ;;  %v375_v2 = vld [vmem:[#allocation6 + $0xf0] sm:$0xff] }
  0x7e   : > { %v389_v62 = vld [vmem:[#allocation6 + $0x160] sm:$0xff]  ;;  %v390_v63 = vld [vmem:[#allocation6 + $0x168] sm:$0xff]  ;;  %v376_v3 = vld [vmem:[#allocation6 + $0xf8] sm:$0xff]  ;;  %v1381_v4 = vpack.c.bf16 %v358_v61, %v357_v59 }
  0x7f   : > { %1370 = vmatpush3.bf16.msra.mxu0 %v1369_v38  ;;  %v1406_v5 = vpack.c.bf16 %v390_v63, %v389_v62  ;;  %v359_v6 = vld [vmem:[#allocation6 + $0x70] sm:$0xff]  ;;  %v1383_v7 = vpack.c.bf16 %v376_v3, %v375_v2  ;;  %v360_v8 = vld [vmem:[#allocation6 + $0x78] sm:$0xff]  ;;  %v744_v11 = vld [vmem:[#allocation8 + $0x80] sm:$0xff] }
  0x80   : > { %1398 = vmatpush3.bf16.msra.mxu1 %v1397_v39  ;;  %1372 = vmatprep.subr.bf16.mxu0 %v1371_v41  ;;  %v391_v9 = vld [vmem:[#allocation6 + $0x170] sm:$0xff]  ;;  %v392_v10 = vld [vmem:[#allocation6 + $0x178] sm:$0xff]  ;;  %v745_v12 = vld [vmem:[#allocation8 + $0x88] sm:$0xff]  ;;  %v1385_v13 = vpack.c.bf16 %v360_v8, %v359_v6 }
  0x81   : > { %1399 = vmatprep.subr.bf16.mxu1 %v1721_v0  ;;  %v1409_v14 = vpack.c.bf16 %v392_v10, %v391_v9  ;;  %v1411_v15 = vpack.c.bf16 %v745_v12, %v744_v11  ;;  %v728_v16 = vld [vmem:[#allocation8] sm:$0xff]  ;;  %v729_v17 = vld [vmem:[#allocation8 + $0x8] sm:$0xff]  ;;  %v746_v20 = vld [vmem:[#allocation8 + $0x90] sm:$0xff] }
  0x82   : > { %v760_v18 = vld [vmem:[#allocation8 + $0x100] sm:$0xff]  ;;  %v761_v19 = vld [vmem:[#allocation8 + $0x108] sm:$0xff]  ;;  %v747_v21 = vld [vmem:[#allocation8 + $0x98] sm:$0xff]  ;;  %v1413_v25 = vpack.c.bf16 %v729_v17, %v728_v16 }
  0x83   : > { %1374 = vmatpush3.bf16.msra.mxu0 %v1373_v48  ;;  %v330_v22 = vld [vmem:[%s1944_s18] sm:$0xff]  ;;  %v1444_v26 = vpack.c.bf16 %v761_v19, %v760_v18  ;;  %v1415_v28 = vpack.c.bf16 %v747_v21, %v746_v20  ;;  %v731_v29 = vld [vmem:[#allocation8 + $0x18] sm:$0xff]  ;;  %v749_v33 = vld [vmem:[#allocation8 + $0xa8] sm:$0xff] }
  0x84   : > { %1401 = vmatpush3.bf16.msra.mxu1 %v1400_v49  ;;  %1376 = vmatprep.subr.bf16.mxu0 %v1375_v51  ;;  %v340_v23 = vld [vmem:[%s1944_s18 + $0x2] sm:$0xff]  ;;  %v341_v35 = vld [vmem:[%s1944_s18 + $0xa] sm:$0xff]  ;;  %v342_v43 = vld [vmem:[%s1944_s18 + $0x12] sm:$0xff] }
  0x85   : > { %1402 = vmatprep.subr.bf16.mxu1 %v1721_v0  ;;  %v730_v27 = vld [vmem:[#allocation8 + $0x10] sm:$0xff]  ;;  %v763_v31 = vld [vmem:[#allocation8 + $0x118] sm:$0xff]  ;;  %v748_v32 = vld [vmem:[#allocation8 + $0xa0] sm:$0xff] }
  0x86   : > { %v762_v30 = vld [vmem:[#allocation8 + $0x110] sm:$0xff]  ;;  %v331_v34 = vld [vmem:[%s1944_s18 + $0x8] sm:$0xff]  ;;  %v1417_v37 = vpack.c.bf16 %v731_v29, %v730_v27  ;;  %v1419_v39 = vpack.c.bf16 %v749_v33, %v748_v32  ;;  %v732_v40 = vld [vmem:[#allocation8 + $0x20] sm:$0xff] }
  0x87   : > { %1378 = vmatpush3.bf16.msra.mxu0 %v1377_v57  ;;  %v1447_v38 = vpack.c.bf16 %v763_v31, %v762_v30  ;;  %v733_v41 = vld [vmem:[#allocation8 + $0x28] sm:$0xff]  ;;  %v332_v42 = vld [vmem:[%s1944_s18 + $0x10] sm:$0xff]  ;;  %v334_v50 = vld [vmem:[%s1944_s18 + $0x20] sm:$0xff] }
  0x88   : > { %1404 = vmatpush3.bf16.msra.mxu1 %v1403_v58  ;;  %1380 = vmatprep.subr.bf16.mxu0 %v1379_v60  ;;  %v1988_v44 = vld [vmem:[%s1944_s18 + $0x19] sm:$0xff]  ;;  %v1421_v45 = vpack.c.bf16 %v733_v41, %v732_v40  ;;  %v1997_v49 = vld [vmem:[%s1944_s18 + $0x21] sm:$0xff] }
  0x89   : > { %1405 = vmatprep.subr.bf16.mxu1 %v1721_v0  ;;  %v333_v46 = vld [vmem:[%s1944_s18 + $0x18] sm:$0xff]  ;;  %v344_v51 = vld [vmem:[%s1944_s18 + $0x22] sm:$0xff] }
  0x8a   : > { %v343_v48 = vld [vmem:[%s1944_s18 + $0x1a] sm:$0xff] }
  0x8b   : > { %1382 = vmatpush3.bf16.msra.mxu0 %v1381_v4  ;;  %v750_v52 = vld [vmem:[#allocation8 + $0xb0] sm:$0xff]  ;;  %v751_v53 = vld [vmem:[#allocation8 + $0xb8] sm:$0xff]  ;;  %v764_v55 = vld [vmem:[#allocation8 + $0x120] sm:$0xff] }
  0x8c   : > { %1407 = vmatpush3.bf16.msra.mxu1 %v1406_v5  ;;  %1384 = vmatprep.subr.bf16.mxu0 %v1383_v7  ;;  %v1423_v54 = vpack.c.bf16 %v751_v53, %v750_v52  ;;  %v765_v56 = vld [vmem:[#allocation8 + $0x128] sm:$0xff]  ;;  %v734_v57 = vld [vmem:[#allocation8 + $0x30] sm:$0xff]  ;;  %v735_v59 = vld [vmem:[#allocation8 + $0x38] sm:$0xff] }
  0x8d   : > { %1408 = vmatprep.subr.bf16.mxu1 %v1721_v0  ;;  %v1450_v58 = vpack.c.bf16 %v765_v56, %v764_v55  ;;  %v1425_v60 = vpack.c.bf16 %v735_v59, %v734_v57  ;;  %v752_v61 = vld [vmem:[#allocation8 + $0xc0] sm:$0xff]  ;;  %v753_v62 = vld [vmem:[#allocation8 + $0xc8] sm:$0xff]  ;;  %v766_v2 = vld [vmem:[#allocation8 + $0x130] sm:$0xff] }
  0x8e   : > { %v1427_v63 = vpack.c.bf16 %v753_v62, %v752_v61  ;;  %v767_v3 = vld [vmem:[#allocation8 + $0x138] sm:$0xff]  ;;  %v736_v4 = vld [vmem:[#allocation8 + $0x40] sm:$0xff]  ;;  %v737_v6 = vld [vmem:[#allocation8 + $0x48] sm:$0xff] }
  0x8f   : > { %1386 = vmatpush3.bf16.msra.mxu0 %v1385_v13  ;;  %v1453_v5 = vpack.c.bf16 %v767_v3, %v766_v2  ;;  %v1429_v7 = vpack.c.bf16 %v737_v6, %v736_v4  ;;  %v754_v8 = vld [vmem:[#allocation8 + $0xd0] sm:$0xff]  ;;  %v755_v9 = vld [vmem:[#allocation8 + $0xd8] sm:$0xff]  ;;  %v768_v10 = vld [vmem:[#allocation8 + $0x140] sm:$0xff] }
  0x90   : > { %1410 = vmatpush3.bf16.msra.mxu1 %v1409_v14  ;;  %1412 = vmatprep.subr.bf16.mxu0 %v1411_v15  ;;  %v769_v11 = vld [vmem:[#allocation8 + $0x148] sm:$0xff]  ;;  %v738_v12 = vld [vmem:[#allocation8 + $0x50] sm:$0xff]  ;;  %v739_v13 = vld [vmem:[#allocation8 + $0x58] sm:$0xff]  ;;  %v1431_v14 = vpack.c.bf16 %v755_v9, %v754_v8 }
  0x91   : > { %1443 = vmatprep.subr.bf16.mxu1 %v1721_v0  ;;  %v1456_v15 = vpack.c.bf16 %v769_v11, %v768_v10  ;;  %v1433_v16 = vpack.c.bf16 %v739_v13, %v738_v12  ;;  %v756_v17 = vld [vmem:[#allocation8 + $0xe0] sm:$0xff]  ;;  %v757_v18 = vld [vmem:[#allocation8 + $0xe8] sm:$0xff]  ;;  %v770_v20 = vld [vmem:[#allocation8 + $0x150] sm:$0xff] }
  0x92   : > { %458 = vmatmul.mubr.f32.vlgmr.msra.gmra.mrb[0].mxu0 %v330_v22  ;;  %v1435_v19 = vpack.c.bf16 %v757_v18, %v756_v17  ;;  %v771_v21 = vld [vmem:[#allocation8 + $0x158] sm:$0xff]  ;;  %v740_v22 = vld [vmem:[#allocation8 + $0x60] sm:$0xff]  ;;  %v758_v27 = vld [vmem:[#allocation8 + $0xf0] sm:$0xff] }
  0x93   : > { %1294 = vmatmul.mubr.f32.vlgmr.msra.gmra.mrb[0].mxu1 %v340_v23  ;;  %462 = vmatprep.mubr.f32.mxu0 %v1973_v24  ;;  %v741_v23 = vld [vmem:[#allocation8 + $0x68] sm:$0xff]  ;;  %v772_v29 = vld [vmem:[#allocation8 + $0x160] sm:$0xff]  ;;  %v742_v32 = vld [vmem:[#allocation8 + $0x70] sm:$0xff] }
  0x94   : > { %1296 = vmatprep.mubr.msk.f32.mxu1 %vm1722_vm0, %v1723_v1  ;;  %1414 = vmatpush3.bf16.msra.mxu0 %v1413_v25  ;;  %v1459_v25 = vpack.c.bf16 %v771_v21, %v770_v20  ;;  %v773_v30 = vld [vmem:[#allocation8 + $0x168] sm:$0xff]  ;;  %v743_v33 = vld [vmem:[#allocation8 + $0x78] sm:$0xff] }
  0x95   : > { %1445 = vmatpush3.bf16.msra.mxu1 %v1444_v26  ;;  %1416 = vmatprep.subr.bf16.mxu0 %v1415_v28  ;;  %v1437_v26 = vpack.c.bf16 %v741_v23, %v740_v22  ;;  %v759_v28 = vld [vmem:[#allocation8 + $0xf8] sm:$0xff]  ;;  %v2033_v10 = vld [vmem:[%s2195_s2] ss:$0 sm:$0xff] }
  0x96   : > { %1446 = vmatprep.subr.bf16.mxu1 %v1721_v0  ;;  %463 = vmatmul.mubr.f32.gmra.mrb[2].mxu0 %v331_v34  ;;  %v1439_v31 = vpack.c.bf16 %v759_v28, %v758_v27  ;;  %v1462_v34 = vpack.c.bf16 %v773_v30, %v772_v29  ;;  %v2043_v18 = vld [vmem:[%s2196_s3] ss:$0 sm:$0xff] }
  0x97   : > { %1297 = vmatmul.mubr.f32.gmra.mrb[2].mxu1 %v341_v35  ;;  %467 = vmatprep.mubr.f32.mxu0 %v337_v36  ;;  %v1441_v35 = vpack.c.bf16 %v743_v33, %v742_v32  ;;  %v774_v36 = vld [vmem:[#allocation8 + $0x170] sm:$0xff] }
  0x98   : > { %1299 = vmatprep.mubr.msk.f32.mxu1 %vm1722_vm0, %v1723_v1  ;;  %1418 = vmatpush3.bf16.msra.mxu0 %v1417_v37  ;;  %v775_v37 = vld [vmem:[#allocation8 + $0x178] sm:$0xff] }
  0x99   : > { %1448 = vmatpush3.bf16.msra.mxu1 %v1447_v38  ;;  %1420 = vmatprep.subr.bf16.mxu0 %v1419_v39  ;;  %v1465_v38 = vpack.c.bf16 %v775_v37, %v774_v36  ;;  %v602_v39 = vlaneseq }
  0x9a   : > { %1449 = vmatprep.subr.bf16.mxu1 %v1721_v0  ;;  %468 = vmatmul.mubr.f32.gmra.mrb[4].mxu0 %v332_v42 }
  0x9b   : > { %1300 = vmatmul.mubr.f32.gmra.mrb[4].mxu1 %v342_v43  ;;  %472 = vmatprep.mubr.f32.mxu0 %v1988_v44  ;;  %v603_v40 = vshrl.u32 %v602_v39, 7 }
  0x9c   : > { %1302 = vmatprep.mubr.msk.f32.mxu1 %vm1722_vm0, %v1723_v1  ;;  %1422 = vmatpush3.bf16.msra.mxu0 %v1421_v45 }
  0x9d   : > { %1424 = vmatprep.subr.bf16.mxu0 %v1423_v54  ;;  %1451 = vmatpush3.bf16.msra.mxu1 %v1450_v58  ;;  %v604_v41 = vadd.s32 8, %v603_v40  ;;  %v2011_v42 = vmul.u32.u64.low 2863311531, %v603_v40  ;;  %v2012_v43 = vmul.u32.u64.high 2863311531, %v603_v40, %v2011_v42  ;;  %v607_v56 = vadd.s32 32, %v603_v40 }
  0x9e   : > { %473 = vmatmul.mubr.f32.gmra.mrb[6].mxu0 %v333_v46  ;;  %1452 = vmatprep.subr.bf16.mxu1 %v1721_v0 }
  0x9f   : > { %1303 = vmatmul.mubr.f32.gmra.mrb[6].mxu1 %v343_v48  ;;  %477 = vmatprep.mubr.f32.mxu0 %v1997_v49  ;;  %v2014_v45 = vmul.u32.u64.low 2863311531, %v604_v41  ;;  %v2015_v46 = vmul.u32.u64.high 2863311531, %v604_v41, %v2014_v45  ;;  %v605_v48 = vadd.s32 16, %v603_v40 }
  0xa0   : > { %1305 = vmatprep.mubr.msk.f32.mxu1 %vm1722_vm0, %v1723_v1  ;;  %1426 = vmatpush3.bf16.msra.mxu0 %v1425_v60  ;;  %v2025_v59 = vmul.u32.u64.low 2863311531, %v607_v56  ;;  %v2026_v60 = vmul.u32.u64.high 2863311531, %v607_v56, %v2025_v59 }
  0xa1   : > { %1428 = vmatprep.subr.bf16.mxu0 %v1427_v63  ;;  %1454 = vmatpush3.bf16.msra.mxu1 %v1453_v5  ;;  %v2018_v52 = vmul.u32.u64.low 2863311531, %v605_v48  ;;  %v2019_v53 = vmul.u32.u64.high 2863311531, %v605_v48, %v2018_v52 }
  0xa2   : > { %478 = vmatmul.mubr.f32.gmra.mrb[8].mxu0 %v334_v50  ;;  %1455 = vmatprep.subr.bf16.mxu1 %v1721_v0  ;;  %v606_v50 = vadd.s32 24, %v603_v40  ;;  %v658_v13 = vshrl.u32 %v2026_v60, 4 }
  0xa3   : > { %1306 = vmatmul.mubr.f32.gmra.mrb[8].mxu1 %v344_v51  ;;  %v614_v51 = vshrl.u32 %v2012_v43, 4  ;;  %v636_v62 = vshrl.u32 %v2019_v53, 4 }
  0xa4   : > { %1340 = vmatprep.mubr.msk.f32.mxu1 %vm1722_vm0, %v1723_v1  ;;  %1430 = vmatpush3.bf16.msra.mxu0 %v1429_v7  ;;  %v2022_v54 = vmul.u32.u64.low 2863311531, %v606_v50  ;;  %v2023_v55 = vmul.u32.u64.high 2863311531, %v606_v50, %v2022_v54  ;;  %v659_v28 = vmul.u32 24, %v658_v13 }
  0xa5   : > { %1432 = vmatprep.subr.bf16.mxu0 %v1431_v14  ;;  %1457 = vmatpush3.bf16.msra.mxu1 %v1456_v15  ;;  %v615_v57 = vmul.u32 24, %v614_v51  ;;  %v637_v5 = vmul.u32 24, %v636_v62 }
  0xa6   : > { %1458 = vmatprep.subr.bf16.mxu1 %v1721_v0  ;;  %v647_v2 = vshrl.u32 %v2023_v55, 4  ;;  %v660_v42 = vsub.s32 %v607_v56, %v659_v28 }
  0xa7   : > { %v616_v61 = vsub.s32 %v603_v40, %v615_v57  ;;  %v638_v17 = vsub.s32 %v605_v48, %v637_v5 }
  0xa8   : > { %1434 = vmatpush3.bf16.msra.mxu0 %v1433_v16  ;;  %v648_v12 = vmul.u32 24, %v647_v2  ;;  %vm667_vm15 = vcmp.ne.s32.totalorder %v660_v42, 0 }
  0xa9   : > { %1436 = vmatprep.subr.bf16.mxu0 %v1435_v19  ;;  %1460 = vmatpush3.bf16.msra.mxu1 %v1459_v25  ;;  %vm663_vm1 = vcmp.ne.s32.totalorder %v616_v61, 0  ;;  %vm668_vm2 = vcmp.lt.s32.totalorder %v616_v61, 0  ;;  %v678_v9 = vadd.s32 24, %v616_v61  ;;  %vm665_vm7 = vcmp.ne.s32.totalorder %v638_v17, 0 }
  0xaa   : > { %1461 = vmatprep.subr.bf16.mxu1 %v1721_v0  ;;  %vm2035_vm3 = vmand %vm668_vm2, %vm663_vm1  ;;  %v649_v27 = vsub.s32 %v606_v50, %v648_v12  ;;  %vm670_vm8 = vcmp.lt.s32.totalorder %v638_v17, 0  ;;  %v680_v40 = vadd.s32 24, %v638_v17  ;;  %vm672_vm1 = vcmp.lt.s32.totalorder %v660_v42, 0 }
  0xab   : > { %v683_v23 = vsel %vm2035_vm3, %v678_v9, %v616_v61  ;;  %vm2061_vm10 = vmand %vm670_vm8, %vm665_vm7  ;;  %v682_v9 = vadd.s32 24, %v660_v42 }
  0xac   : > { %1438 = vmatpush3.bf16.msra.mxu0 %v1437_v26  ;;  %vm2054_vm9 = vcmp.lt.s32.totalorder %v683_v23, 16  ;;  %vm666_vm11 = vcmp.ne.s32.totalorder %v649_v27, 0  ;;  %vm671_vm12 = vcmp.lt.s32.totalorder %v649_v27, 0  ;;  %v681_v53 = vadd.s32 24, %v649_v27  ;;  %vm2094_vm3 = vmand %vm672_vm1, %vm667_vm15 }
  0xad   : > { %1440 = vmatprep.subr.bf16.mxu0 %v1439_v31  ;;  %1463 = vmatpush3.bf16.msra.mxu1 %v1462_v34  ;;  %v685_v56 = vsel %vm2061_vm10, %v680_v40, %v638_v17  ;;  %vm2079_vm14 = vmand %vm671_vm12, %vm666_vm11 }
  0xae   : > { %1464 = vmatprep.subr.bf16.mxu1 %v1721_v0  ;;  %v625_v0 = vshrl.u32 %v2015_v46, 4  ;;  %vm2086_vm2 = vcmp.lt.s32.totalorder %v685_v56, 16 }
  0xb0   : > { %1442 = vmatpush3.bf16.msra.mxu0 %v1441_v35  ;;  %v626_v58 = vmul.u32 24, %v625_v0 }
  0xb1   : > { %1466 = vmatpush3.bf16.msra.mxu1 %v1465_v38 }
  0xb2   : > { %v627_v63 = vsub.s32 %v604_v41, %v626_v58 }
  0xb4   : > { %vm664_vm4 = vcmp.ne.s32.totalorder %v627_v63, 0  ;;  %vm669_vm5 = vcmp.lt.s32.totalorder %v627_v63, 0  ;;  %v679_v20 = vadd.s32 24, %v627_v63 }
  0xb5   : > { %vm2049_vm6 = vmand %vm669_vm5, %vm664_vm4 }
  0xb6   : > { %v684_v34 = vsel %vm2049_vm6, %v679_v20, %v627_v63  ;;  %v687_v20 = vsel %vm2094_vm3, %v682_v9, %v660_v42 }
  0xb7   : > { %vm2068_vm13 = vcmp.lt.s32.totalorder %v684_v34, 16  ;;  %vm2113_vm5 = vcmp.lt.s32.totalorder %v687_v20, 16 }
 0x165   : > { %v1157_v3 = vpop.f32.mrb[0].mxu0 }
 0x166   : > { %v549_v4 = vpop.f32.mrb[0].mxu1  ;;  %v1158_v6 = vpop.f32.mrb[1].mxu0 }
 0x167   : > { %v1295_v7 = vpop.f32.mrb[1].mxu1  ;;  %v1159_v8 = vadd.f32 %v1158_v6, %v1157_v3  ;;  %v686_v3 = vsel %vm2079_vm14, %v681_v53, %v649_v27 }
 0x168   : > { %vm2101_vm4 = vcmp.lt.s32.totalorder %v686_v3, 16 }
 0x169   : > { %v550_v14 = vadd.f32 %v1159_v8, %v549_v4  ;;  %v1160_v15 = vpop.f32.mrb[2].mxu0 }
 0x16a   : > { %v554_v16 = vpop.f32.mrb[2].mxu1  ;;  %v1161_v19 = vpop.f32.mrb[3].mxu0 }
 0x16b   : > { %v1298_v21 = vpop.f32.mrb[3].mxu1  ;;  %v580_v22 = vmul.f32 %v2033_v10, %v550_v14  ;;  %v1162_v25 = vadd.f32 %v1161_v19, %v1160_v15 }
 0x16d   : > { %v592_v29 = vadd.f32 %v2043_v18, %v580_v22  ;;  %v555_v30 = vadd.f32 %v1162_v25, %v554_v16  ;;  %v1163_v31 = vpop.f32.mrb[4].mxu0 }
 0x16e   : > { %v559_v32 = vpop.f32.mrb[4].mxu1  ;;  %v1164_v35 = vpop.f32.mrb[5].mxu0 }
 0x16f   : > { %v1301_v36 = vpop.f32.mrb[5].mxu1  ;;  %v597_v37 = vmax.f32 %v592_v29, 0.0  ;;  %v581_v38 = vmul.f32 %v2033_v10, %v555_v30  ;;  %v1165_v39 = vadd.f32 %v1164_v35, %v1163_v31 }
 0x171   : > { %v703_v43 = vsel %vm2054_vm9, %v597_v37, 0.0  ;;  %v593_v45 = vadd.f32 %v2043_v18, %v581_v38  ;;  %v560_v46 = vadd.f32 %v1165_v39, %v559_v32  ;;  %v1166_v48 = vpop.f32.mrb[6].mxu0  ;;  %1553 = vmatprep.mubr.msk.f32.mxu0 %vm2054_vm9, %v597_v37  ;;  %v1112_v38 = vld [vmem:[%s2198_s5] ss:$0 sm:$0xff] }
 0x172   : > { %v564_v50 = vpop.f32.mrb[6].mxu1  ;;  %708 = vst [vmem:[#allocation2 + $0x8] sm:$0xff] %v703_v43  ;;  %v1167_v52 = vpop.f32.mrb[7].mxu0  ;;  %v1113_v43 = vld [vmem:[%s2199_s6] ss:$0 sm:$0xff] }
 0x173   : > { %v1304_v0 = vpop.f32.mrb[7].mxu1  ;;  %v598_v54 = vmax.f32 %v593_v45, 0.0  ;;  %v582_v55 = vmul.f32 %v2033_v10, %v560_v46  ;;  %v1168_v57 = vadd.f32 %v1167_v52, %v1166_v48 }
 0x175   : > { %v704_v59 = vsel %vm2068_vm13, %v598_v54, 0.0  ;;  %v594_v60 = vadd.f32 %v2043_v18, %v582_v55  ;;  %v565_v61 = vadd.f32 %v1168_v57, %v564_v50  ;;  %v1169_v62 = vpop.f32.mrb[8].mxu0 }
 0x176   : > { %v569_v63 = vpop.f32.mrb[8].mxu1  ;;  %709 = vst [vmem:[#allocation2 + $0x10] sm:$0xff] %v704_v59  ;;  %v1170_v4 = vpop.f32.mrb[9].mxu0 }
 0x177   : > { %v1307_v5 = vpop.f32.mrb[9].mxu1  ;;  %v599_v6 = vmax.f32 %v594_v60, 0.0  ;;  %v583_v7 = vmul.f32 %v2033_v10, %v565_v61  ;;  %v1171_v8 = vadd.f32 %v1170_v4, %v1169_v62 }
 0x179   : > { %v705_v12 = vsel %vm2086_vm2, %v599_v6, 0.0  ;;  %v595_v13 = vadd.f32 %v2043_v18, %v583_v7  ;;  %v570_v14 = vadd.f32 %v1171_v8, %v569_v63  ;;  %v713_v15 = vld [vmem:[#allocation2 + $0x7] sm:$0xff] }
 0x17a   : > { %710 = vst [vmem:[#allocation2 + $0x18] sm:$0xff] %v705_v12  ;;  %841 = vmatmul.mubr.f32.vlgmr.msra.gmra.mrb[10].mxu0 %v713_v15 }
 0x17b   : > { %v600_v17 = vmax.f32 %v595_v13, 0.0  ;;  %v584_v19 = vmul.f32 %v2033_v10, %v570_v14  ;;  %1554 = vmatprep.mubr.msk.f32.mxu0 %vm2068_vm13, %v598_v54 }
 0x17d   : > { %v706_v21 = vsel %vm2101_vm4, %v600_v17, 0.0  ;;  %v596_v22 = vadd.f32 %v2043_v18, %v584_v19  ;;  %v723_v23 = vld [vmem:[#allocation2 + $0x9] sm:$0xff] }
 0x17e   : > { %v714_v25 = vld [vmem:[#allocation2 + $0xf] sm:$0xff]  ;;  %711 = vst [vmem:[#allocation2 + $0x20] sm:$0xff] %v706_v21  ;;  %1341 = vmatmul.mubr.f32.vlgmr.msra.gmra.mrb[10].mxu1 %v723_v23 }
 0x17f   : > { %846 = vmatmul.mubr.f32.gmra.mrb[12].mxu0 %v714_v25  ;;  %v601_v10 = vmax.f32 %v596_v22, 0.0  ;;  %1343 = vmatprep.mubr.msk.f32.mxu1 %vm1722_vm0, %v1723_v1 }
 0x180   : > { %1555 = vmatprep.mubr.msk.f32.mxu0 %vm2086_vm2, %v599_v6 }
 0x181   : > { %v707_v27 = vsel %vm2113_vm5, %v601_v10, 0.0  ;;  %v724_v18 = vld [vmem:[#allocation2 + $0x11] sm:$0xff] }
 0x182   : > { %v715_v28 = vld [vmem:[#allocation2 + $0x17] sm:$0xff]  ;;  %712 = vst [vmem:[#allocation2 + $0x28] sm:$0xff] %v707_v27  ;;  %1344 = vmatmul.mubr.f32.gmra.mrb[12].mxu1 %v724_v18 }
 0x183   : > { %851 = vmatmul.mubr.f32.gmra.mrb[14].mxu0 %v715_v28  ;;  %1346 = vmatprep.mubr.msk.f32.mxu1 %vm1722_vm0, %v1723_v1 }
 0x184   : > { %1556 = vmatprep.mubr.msk.f32.mxu0 %vm2101_vm4, %v600_v17 }
 0x185   : > { %v725_v29 = vld [vmem:[#allocation2 + $0x19] sm:$0xff] }
 0x186   : > { %v716_v30 = vld [vmem:[#allocation2 + $0x1f] sm:$0xff]  ;;  %1347 = vmatmul.mubr.f32.gmra.mrb[14].mxu1 %v725_v29 }
 0x187   : > { %855 = vmatmul.mubr.f32.gmra.mrb[16].mxu0 %v716_v30  ;;  %1349 = vmatprep.mubr.msk.f32.mxu1 %vm1722_vm0, %v1723_v1 }
 0x188   : > { %1557 = vmatprep.mubr.msk.f32.mxu0 %vm2113_vm5, %v601_v10 }
 0x189   : > { %v726_v31 = vld [vmem:[#allocation2 + $0x21] sm:$0xff]  ;;  %v727_v33 = vld [vmem:[#allocation2 + $0x29] sm:$0xff] }
 0x18a   : > { %v717_v32 = vld [vmem:[#allocation2 + $0x27] sm:$0xff]  ;;  %1350 = vmatmul.mubr.f32.gmra.mrb[16].mxu1 %v726_v31 }
 0x18b   : > { %860 = vmatmul.mubr.f32.gmra.mrb[18].mxu0 %v717_v32  ;;  %1352 = vmatprep.mubr.msk.f32.mxu1 %vm1722_vm0, %v1723_v1 }
 0x18e   : > { %1353 = vmatmul.mubr.f32.gmra.mrb[18].mxu1 %v727_v33 }
 0x24d   : > { %v1225_v34 = vpop.f32.mrb[10].mxu0 }
 0x24e   : > { %v1226_v35 = vpop.f32.mrb[11].mxu0 }
 0x24f   : > { %v1227_v36 = vadd.f32 %v1226_v35, %v1225_v34 }
 0x251   : > { %v931_v37 = vpop.f32.mrb[10].mxu1 }
 0x252   : > { %v1228_v39 = vpop.f32.mrb[12].mxu0  ;;  %v932_v40 = vadd.f32 %v1227_v36, %v931_v37  ;;  %v1342_v41 = vpop.f32.mrb[11].mxu1 }
 0x253   : > { %v1229_v42 = vpop.f32.mrb[13].mxu0 }
 0x254   : > { %v1230_v1 = vadd.f32 %v1229_v42, %v1228_v39  ;;  %v961_v45 = vmul.f32 %v1112_v38, %v932_v40 }
 0x255   : > { %v936_v46 = vpop.f32.mrb[12].mxu1 }
 0x256   : > { %v1231_v48 = vpop.f32.mrb[14].mxu0  ;;  %v972_v50 = vadd.f32 %v1113_v43, %v961_v45  ;;  %v937_v51 = vadd.f32 %v1230_v1, %v936_v46  ;;  %v1345_v52 = vpop.f32.mrb[13].mxu1 }
 0x257   : > { %v1232_v53 = vpop.f32.mrb[15].mxu0 }
 0x258   : > { %v980_v0 = vadd.f32 %v972_v50, %v1963_v47  ;;  %v962_v54 = vmul.f32 %v1112_v38, %v937_v51 }
 0x259   : > { %v941_v55 = vpop.f32.mrb[14].mxu1 }
 0x25a   : > { %v1234_v56 = vpop.f32.mrb[16].mxu0  ;;  %v984_v57 = vmax.f32 %v980_v0, 0.0  ;;  %v973_v58 = vadd.f32 %v1113_v43, %v962_v54  ;;  %v1348_v59 = vpop.f32.mrb[15].mxu1 }
 0x25b   : > { %v1235_v60 = vpop.f32.mrb[17].mxu0 }
 0x25c   : > { %v1236_v61 = vadd.f32 %v1235_v60, %v1234_v56  ;;  %988 = vst [vmem:[%s325_s23] sm:$0xff] %v984_v57  ;;  %v981_v62 = vadd.f32 %v973_v58, %v1973_v24 }
 0x25d   : > { %v945_v63 = vpop.f32.mrb[16].mxu1 }
 0x25e   : > { %v1237_v2 = vpop.f32.mrb[18].mxu0  ;;  %v985_v3 = vmax.f32 %v981_v62, 0.0  ;;  %v946_v4 = vadd.f32 %v1236_v61, %v945_v63  ;;  %v1351_v5 = vpop.f32.mrb[17].mxu1 }
 0x25f   : > { %v1238_v6 = vpop.f32.mrb[19].mxu0 }
 0x260   : > { %v1239_v47 = vadd.f32 %v1238_v6, %v1237_v2  ;;  %989 = vst [vmem:[%s325_s23 + $0x8] sm:$0xff] %v985_v3  ;;  %v963_v7 = vmul.f32 %v1112_v38, %v946_v4 }
 0x261   : > { %v950_v8 = vpop.f32.mrb[18].mxu1 }
 0x262   : > { %v974_v9 = vadd.f32 %v1113_v43, %v963_v7  ;;  %v951_v11 = vadd.f32 %v1239_v47, %v950_v8  ;;  %v1354_v12 = vpop.f32.mrb[19].mxu1 }
 0x264   : > { %v982_v13 = vadd.f32 %v974_v9, %v1988_v44  ;;  %v964_v14 = vmul.f32 %v1112_v38, %v951_v11 }
 0x266   : > { %v986_v24 = vmax.f32 %v982_v13, 0.0  ;;  %v975_v15 = vadd.f32 %v1113_v43, %v964_v14 }
 0x268   : > { %1114 = vst [vmem:[%s325_s23 + $0x10] sm:$0xff] %v986_v24  ;;  %v983_v16 = vadd.f32 %v975_v15, %v1997_v49 }
 0x26a   : > { %v987_v17 = vmax.f32 %v983_v16, 0.0 }
 0x26c   : > { %1115 = vst [vmem:[%s325_s23 + $0x18] sm:$0xff] %v987_v17 }
 0x26d   : > { %1657 = shalt.err (!%p1654_p7)
}
 0x26e   : > { %s1658_s15 = scalar_lea.hbm %s2150_s30, 512  ;;  %s1662_s1 = scalar_lea.hbm %s2200_s7, 2048 }
 0x26f   : > { %p1659_p9 = scmp.ne.s32.totalorder %s2150_s30, %s1658_s15  ;;  %p1663_p5 = scmp.lt.u32.totalorder %s2150_s30, %s2200_s7 }
 0x270   : > { %p1664_p10 = scmp.lt.u32.totalorder %s1662_s1, %s1658_s15  ;;  %p1666_p2 = scmp.lt.u32.totalorder %s1658_s15, %s2150_s30 }
 0x271   : > { %p1660_p12 = pnand %p1659_p9, %p1885_p6 }
 0x272   : > { %p1665_p1 = por %p1664_p10, %p1663_p5 }
 0x273   : > { %p1661_p0 = pneg %p1660_p12 }
 0x274   : > { %p1667_p4 = por %p1666_p2, %p1665_p1 }
 0x276   : > { %p1668_p8 = pnand %p1667_p4, %p1661_p0 }
 0x278   : > { %1671 = shalt.err (!%p1668_p8)
}
 0x279   : > { %s1725_s11 = smov 128   ;;  %s1726_s18 = smov 8  }
 0x27a   : > { %1489 = dma.vmem_to_hbm [thread:$0]  (%p1885_p6), %s2144_s29, 512, %s2150_s30, %s994_s9, %s1725_s11, %s1725_s11, %s1726_s18  }
 0x27b PF: > { %p1511_p11 = scmp.ge.s32.totalorder %s1714_s27, 2  ;;  %s1023_s20 = sand.u32 1, %s1702_s24  }
 0x27c   : > { %p2241_p13 = scmp.ne.s32.totalorder %s2208_s8, 0  ;;  %s1024_s28 = scalar_lea.sflag [#allocation5], %s1023_s20 }
 0x27e   : > { %p1503_p3 = pnand %p1511_p11, %p2241_p13 }
 0x280   : > { %1697 = dma.done.wait (!%p1503_p3), %s1024_s28, 512  }
 0x281   : > { %1699 = vsyncadd (!%p1503_p3), %s1024_s28, 4294966784  ;;  %p21_p7 = scmp.ge.s32.totalorder %s1875_s12, 6   ;;  %s2242_s24 = smov %s1706_s25 }
 0x282   : > { %s2243_s25 = smov %s1710_s26  ;;  %s2244_s26 = smov %s1891_s17 }
 0x283   : > { %s2245_s27 = smov %s1875_s12  ;;  %23 = sbr.rel (!%p21_p7) target bundleno = 8 (0x8), region = 102 }
 0x28a   :  { %1029 = vsyncpa [#allocation4], 1 }
 0x28b   :  { %1031 = vsyncpa [#allocation4 + $0x1], 1 }
 0x28c   :  { %1032 = vsyncpa [#allocation7], 1 }
 0x28d   :  { %1033 = vsyncpa [#allocation5], 1 }
 0x28e   :  { %1035 = vsyncpa [#allocation5 + $0x1], 1 }

</bundles_post_ra>
